<compile_context>
chip_gen: v7x
topology: tpu7x:2x2x1
jax: 0.10.0
libtpu: 0.0.40
codegen_flags: <defaults>
</compile_context>

<pallas_src>
import functools

import jax
import jax.numpy as jnp
from jax.experimental import pallas as pl
from jax.experimental.pallas import tpu as pltpu

EPS = 1e-6
_VMEM_LIMIT = 40 * 1024 * 1024   # sized to fit v7x (64 MiB) as well as v5e/v6e


def _layer_norm_f32(x, gamma, beta):
    # x: (rows, H) f32; gamma/beta: (1, H) f32. Biased variance, eps inside rsqrt.
    mean = jnp.mean(x, axis=-1, keepdims=True)
    c = x - mean
    var = jnp.mean(c * c, axis=-1, keepdims=True)
    return c * jax.lax.rsqrt(var + EPS) * gamma + beta


# ----------------------------------------------------------------------------
# Kernel 1: residual-norm wrapped multi-head self-attention (one batch element)
# ----------------------------------------------------------------------------
def _attn_block_kernel(num_heads, head_dim,
                       x_ref, g_ref, b_ref,
                       wqkv_ref, bqkv_ref, wo_ref, bo_ref,
                       o_ref, attn_buf):
    # x_ref: (1, S, H) f32; wqkv: (H, 3H) bf16; wo: (H, H) bf16;
    # biases / LN params: (1, ·) f32; attn_buf: (S, H) bf16 VMEM scratch.
    S, H = x_ref.shape[1], x_ref.shape[2]
    x = x_ref[0].astype(jnp.float32)                        # (S, H)
    y = _layer_norm_f32(x, g_ref[...], b_ref[...])          # f32 LayerNorm
    yb = y.astype(jnp.bfloat16)                             # MXU operand

    # Fused Q/K/V projection: one wide matmul, f32 accumulation, then a single
    # cast back to bf16 (Q/K/V stay bf16 for the attention matmuls).
    qkv = jnp.dot(yb, wqkv_ref[...], preferred_element_type=jnp.float32)
    qkv = (qkv + bqkv_ref[...]).astype(jnp.bfloat16)        # (S, 3H) bf16

    inv_temp = 1.0 / (head_dim ** 0.5)
    q_tile = 256 if (S % 256 == 0) else S                   # bound score VMEM
    n_qt = S // q_tile

    for h in range(num_heads):                              # static unroll
        csl = slice(h * head_dim, (h + 1) * head_dim)
        kh = qkv[:, H + h * head_dim:H + (h + 1) * head_dim]          # (S, hd)
        vh = qkv[:, 2 * H + h * head_dim:2 * H + (h + 1) * head_dim]  # (S, hd)
        for t in range(n_qt):                               # static unroll
            rsl = slice(t * q_tile, (t + 1) * q_tile)
            qh = qkv[rsl, csl]                              # (TQ, hd) bf16
            # scores = qh @ kh^T / sqrt(hd), f32 accumulation on the MXU
            s = jax.lax.dot_general(qh, kh, (((1,), (1,)), ((), ())),
                                    preferred_element_type=jnp.float32)
            s = s * inv_temp
            # numerically stable softmax in f32; divide goes to the EUP slot
            s = s - jnp.max(s, axis=-1, keepdims=True)
            p = jnp.exp(s)                                  # (TQ, S) f32
            p = p * pl.reciprocal(jnp.sum(p, axis=-1, keepdims=True),
                                  approx=True)
            oh = jnp.dot(p.astype(jnp.bfloat16), vh,
                         preferred_element_type=jnp.float32)          # (TQ, hd)
            attn_buf[rsl, csl] = oh.astype(jnp.bfloat16)    # "concat" = col write

    # Single full-width output projection (K = H, not head_dim) + residual add.
    z = jnp.dot(attn_buf[...], wo_ref[...],
                preferred_element_type=jnp.float32) + bo_ref[...]
    o_ref[0] = (z + x).astype(o_ref.dtype)                  # dropout = identity


def _attention_res_block(x, p, *, num_heads):
    B, S, H = x.shape
    assert H % num_heads == 0, "hidden_dim must be divisible by num_heads"
    head_dim = H // num_heads
    kernel = functools.partial(_attn_block_kernel, num_heads, head_dim)

    flops = B * (2 * S * H * 3 * H + 4 * S * S * H + 2 * S * H * H)
    bytes_accessed = 2 * B * S * H * 4 + 4 * H * H * 2 + 6 * H * 4
    cost = pl.CostEstimate(flops=flops,
                           transcendentals=B * num_heads * S * S,
                           bytes_accessed=bytes_accessed)

    # Constant weights / biases / LN params: whole-array single-buffered VMEM
    # residency (their block index never changes, so pipelined double buffering
    # would only burn VMEM).
    resident = pl.BlockSpec(memory_space=pltpu.MemorySpace.VMEM)

    return pl.pallas_call(
        kernel,
        out_shape=jax.ShapeDtypeStruct((B, S, H), x.dtype),
        grid_spec=pltpu.PrefetchScalarGridSpec(
            num_scalar_prefetch=0,
            grid=(B,),
            in_specs=[
                pl.BlockSpec((1, S, H), lambda b: (b, 0, 0)),   # x
                resident, resident,                              # ln1 gamma, beta
                resident, resident,                              # Wqkv, bqkv
                resident, resident,                              # Wo, bo
            ],
            out_specs=pl.BlockSpec((1, S, H), lambda b: (b, 0, 0)),
            scratch_shapes=[pltpu.VMEM((S, H), jnp.bfloat16)],   # head outputs
        ),
        compiler_params=pltpu.CompilerParams(
            dimension_semantics=("parallel",),
            vmem_limit_bytes=_VMEM_LIMIT),
        cost_estimate=cost,
    )(x, p["ln1_g"], p["ln1_b"], p["wqkv"], p["bqkv"], p["wo"], p["bo"])


# ----------------------------------------------------------------------------
# Kernel 2: residual-norm wrapped feed-forward network (row-tiled)
# ----------------------------------------------------------------------------
def _ffn_block_kernel(x_ref, g_ref, b_ref, w1_ref, b1_ref, w2_ref, b2_ref, o_ref):
    # x_ref: (tile, H) f32; w1: (H, F) bf16; w2: (F, H) bf16; biases f32.
    x = x_ref[...].astype(jnp.float32)
    y = _layer_norm_f32(x, g_ref[...], b_ref[...])
    h = jnp.dot(y.astype(jnp.bfloat16), w1_ref[...],
                preferred_element_type=jnp.float32) + b1_ref[...]
    h = jnp.maximum(h, 0.0)                                 # ReLU (dropout identity)
    z = jnp.dot(h.astype(jnp.bfloat16), w2_ref[...],
                preferred_element_type=jnp.float32) + b2_ref[...]
    o_ref[...] = (z + x).astype(o_ref.dtype)


def _pick_row_tile(rows, tile_rows):
    # Choose a tile that divides `rows` exactly (no pad / slice HBM round trip).
    tile_rows = max(8, (tile_rows // 8) * 8)
    if rows <= tile_rows or rows % 8 != 0:
        return rows                                          # single full block
    tile = tile_rows
    while rows % tile != 0:                                  # stays a multiple of 8
        tile -= 8
    return tile


def _ffn_res_block(y1, p, *, tile_rows=512):
    B, S, H = y1.shape
    F = p["w1"].shape[1]
    rows = B * S
    x2 = y1.reshape(rows, H)

    tile = _pick_row_tile(rows, tile_rows)
    grid = (rows // tile,)

    flops = 2 * 2 * rows * H * F
    bytes_accessed = 2 * rows * H * 4 + 2 * H * F * 2 + (F + 3 * H) * 4
    cost = pl.CostEstimate(flops=flops, transcendentals=rows,
                           bytes_accessed=bytes_accessed)

    resident = pl.BlockSpec(memory_space=pltpu.MemorySpace.VMEM)

    out2 = pl.pallas_call(
        _ffn_block_kernel,
        out_shape=jax.ShapeDtypeStruct((rows, H), y1.dtype),
        grid_spec=pltpu.PrefetchScalarGridSpec(
            num_scalar_prefetch=0,
            grid=grid,
            in_specs=[
                pl.BlockSpec((tile, H), lambda i: (i, 0)),   # rows of y1
                resident, resident,                           # ln2 gamma, beta
                resident, resident,                           # W1 (bf16), b1
                resident, resident,                           # W2 (bf16), b2
            ],
            out_specs=pl.BlockSpec((tile, H), lambda i: (i, 0)),
        ),
        compiler_params=pltpu.CompilerParams(
            dimension_semantics=("parallel",),
            vmem_limit_bytes=_VMEM_LIMIT),
        cost_estimate=cost,
    )(x2, p["ln2_g"], p["ln2_b"], p["w1"], p["fb1"], p["w2"], p["fb2"])
    return out2.reshape(B, S, H)


def encoder_layer_forward(x, params, *, num_heads, tile_rows=512):
    """x: [B, S, H] -> [B, S, H]. Eval-mode EncoderLayer forward (mask=None)."""
    y1 = _attention_res_block(x, params, num_heads=num_heads)
    return _ffn_res_block(y1, params, tile_rows=tile_rows)


# ----------------------------------------------------------------------------
# Pure-JAX reference with the same mixed-precision policy (bf16 MXU operands,
# f32 accumulation, f32 LayerNorm / softmax) so the structural check is tight.
# ----------------------------------------------------------------------------
def _reference(x, p, *, num_heads):
    f32 = jnp.float32

    def ln(v, g, b):
        m = jnp.mean(v, -1, keepdims=True)
        var = jnp.mean((v - m) ** 2, -1, keepdims=True)
        return (v - m) * jax.lax.rsqrt(var + EPS) * g + b

    def mm(a, w):
        return jnp.dot(a.astype(jnp.bfloat16), w, preferred_element_type=f32)

    B, S, H = x.shape
    hd = H // num_heads
    xf = x.astype(f32)

    y = ln(xf, p["ln1_g"], p["ln1_b"])
    qkv = mm(y, p["wqkv"]) + p["bqkv"]
    q, k, v = qkv[..., :H], qkv[..., H:2 * H], qkv[..., 2 * H:]

    def split(t):  # (B,S,H) -> (B,nh,S,hd)
        return t.reshape(B, S, num_heads, hd).transpose(0, 2, 1, 3)

    qh, kh, vh = split(q), split(k), split(v)
    s = jnp.einsum("bnqd,bnkd->bnqk", qh.astype(jnp.bfloat16),
                   kh.astype(jnp.bfloat16),
                   preferred_element_type=f32) / (hd ** 0.5)
    a = jax.nn.softmax(s, axis=-1)
    o = jnp.einsum("bnqk,bnkd->bnqd", a.astype(jnp.bfloat16),
                   vh.astype(jnp.bfloat16), preferred_element_type=f32)
    o = o.transpose(0, 2, 1, 3).reshape(B, S, H)
    y1 = xf + mm(o, p["wo"]) + p["bo"]

    y2 = ln(y1, p["ln2_g"], p["ln2_b"])
    hdn = jnp.maximum(mm(y2, p["w1"]) + p["fb1"], 0.0)
    out = y1 + mm(hdn, p["w2"]) + p["fb2"]
    return out.astype(x.dtype)


if __name__ == "__main__":
    B, S, H, NUM_HEADS = 2, 8, 128, 4       # batch, seq, hidden, heads
    F = 4 * H
    key = jax.random.PRNGKey(0)
    keys = jax.random.split(key, 12)

    x = jax.random.normal(keys[0], (B, S, H), dtype=jnp.float32)

    def linear_w(k, fan_in, fan_out):        # xavier_uniform-style
        bound = (6.0 / (fan_in + fan_out)) ** 0.5
        return jax.random.uniform(k, (fan_in, fan_out), jnp.float32, -bound, bound)

    def linear_b(k, fan_in, fan_out):        # nn.Linear default bias range
        bound = 1.0 / (fan_in ** 0.5)
        return jax.random.uniform(k, (1, fan_out), jnp.float32, -bound, bound)

    wq, wk, wv = (linear_w(keys[i], H, H) for i in (1, 3, 5))
    bq, bk, bv = (linear_b(keys[i], H, H) for i in (2, 4, 6))

    params = {
        # LayerNorm defaults: gamma=1, beta=0
        "ln1_g": jnp.ones((1, H), jnp.float32), "ln1_b": jnp.zeros((1, H), jnp.float32),
        "ln2_g": jnp.ones((1, H), jnp.float32), "ln2_b": jnp.zeros((1, H), jnp.float32),
        # MultiHeadAttention: Q/K/V projections fused into one (H, 3H) weight
        # (weights shipped in bf16 for the MXU; accuracy policy, f32 accumulate).
        "wqkv": jnp.concatenate([wq, wk, wv], axis=1).astype(jnp.bfloat16),
        "bqkv": jnp.concatenate([bq, bk, bv], axis=1),
        "wo": linear_w(keys[7], H, H).astype(jnp.bfloat16), "bo": linear_b(keys[8], H, H),
        # FeedForwardNetwork: xavier weights, zero bias (per _reset_parameters)
        "w1": linear_w(keys[9], H, F).astype(jnp.bfloat16),
        "fb1": jnp.zeros((1, F), jnp.float32),
        "w2": linear_w(keys[10], F, H).astype(jnp.bfloat16),
        "fb2": jnp.zeros((1, H), jnp.float32),
    }

    out = encoder_layer_forward(x, params, num_heads=NUM_HEADS)
    out = jax.block_until_ready(out)

    ref = _reference(x, params, num_heads=NUM_HEADS)
    assert out.shape == (B, S, H)
    assert bool(jnp.all(jnp.isfinite(out)))
    assert jnp.allclose(out, ref, atol=1e-2, rtol=1e-2), "mismatch vs reference"

    print("KERNEL_OK")
</pallas_src>

<mosaic_0001>
module attributes {stable_mosaic.version = 11 : i64} {
  func.func @_attn_block_kernel(%arg0: i32, %arg1: memref<1x8x128xf32, #tpu.memory_space<vmem>>, %arg2: memref<1x128xf32, #tpu.memory_space<vmem>>, %arg3: memref<1x128xf32, #tpu.memory_space<vmem>>, %arg4: memref<128x384xbf16, #tpu.memory_space<vmem>>, %arg5: memref<1x384xf32, #tpu.memory_space<vmem>>, %arg6: memref<128x128xbf16, #tpu.memory_space<vmem>>, %arg7: memref<1x128xf32, #tpu.memory_space<vmem>>, %arg8: memref<1x8x128xf32, #tpu.memory_space<vmem>>, %arg9: memref<8x128xbf16, #tpu.memory_space<vmem>>) attributes {dimension_semantics = [#tpu.dimension_semantics<parallel>], iteration_bounds = array<i64: 2>, scalar_prefetch = 0 : i64, scratch_operands = 1 : i64, tpu.core_type = #tpu.core_type<tc>, window_params = [{transform_indices = @transform_0, window_bounds = array<i64: 1, 8, 128>}, {pipeline_mode = #tpu.pipeline_mode<synchronous>, transform_indices = @transform_1, window_bounds = array<i64: 1, 128>}, {pipeline_mode = #tpu.pipeline_mode<synchronous>, transform_indices = @transform_2, window_bounds = array<i64: 1, 128>}, {pipeline_mode = #tpu.pipeline_mode<synchronous>, transform_indices = @transform_3, window_bounds = array<i64: 128, 384>}, {pipeline_mode = #tpu.pipeline_mode<synchronous>, transform_indices = @transform_4, window_bounds = array<i64: 1, 384>}, {pipeline_mode = #tpu.pipeline_mode<synchronous>, transform_indices = @transform_5, window_bounds = array<i64: 128, 128>}, {pipeline_mode = #tpu.pipeline_mode<synchronous>, transform_indices = @transform_6, window_bounds = array<i64: 1, 128>}, {transform_indices = @transform_7, window_bounds = array<i64: 1, 8, 128>}]} {
    %c0 = arith.constant 0 : index
    %c0_0 = arith.constant 0 : index
    %c0_1 = arith.constant 0 : index
    %0 = vector.load %arg1[%c0, %c0_0, %c0_1] : memref<1x8x128xf32, #tpu.memory_space<vmem>>, vector<1x8x128xf32>
    %1 = vector.shape_cast %0 : vector<1x8x128xf32> to vector<8x128xf32>
    %c0_2 = arith.constant 0 : index
    %c0_3 = arith.constant 0 : index
    %2 = vector.load %arg2[%c0_2, %c0_3] : memref<1x128xf32, #tpu.memory_space<vmem>>, vector<1x128xf32>
    %c0_4 = arith.constant 0 : index
    %c0_5 = arith.constant 0 : index
    %3 = vector.load %arg3[%c0_4, %c0_5] : memref<1x128xf32, #tpu.memory_space<vmem>>, vector<1x128xf32>
    %cst = arith.constant dense<0.000000e+00> : vector<8xf32>
    %4 = vector.multi_reduction <add>, %1, %cst [1] : vector<8x128xf32> to vector<8xf32>
    %5 = vector.shape_cast %4 : vector<8xf32> to vector<8x1xf32>
    %cst_6 = arith.constant 1.280000e+02 : f32
    %6 = vector.broadcast %cst_6 : f32 to vector<8x1xf32>
    %7 = arith.divf %5, %6 : vector<8x1xf32>
    %8 = vector.broadcast %7 : vector<8x1xf32> to vector<8x128xf32>
    %9 = arith.subf %1, %8 : vector<8x128xf32>
    %10 = arith.mulf %9, %9 : vector<8x128xf32>
    %cst_7 = arith.constant dense<0.000000e+00> : vector<8xf32>
    %11 = vector.multi_reduction <add>, %10, %cst_7 [1] : vector<8x128xf32> to vector<8xf32>
    %12 = vector.shape_cast %11 : vector<8xf32> to vector<8x1xf32>
    %cst_8 = arith.constant 1.280000e+02 : f32
    %13 = vector.broadcast %cst_8 : f32 to vector<8x1xf32>
    %14 = arith.divf %12, %13 : vector<8x1xf32>
    %cst_9 = arith.constant 9.99999997E-7 : f32
    %15 = vector.broadcast %cst_9 : f32 to vector<8x1xf32>
    %16 = arith.addf %14, %15 : vector<8x1xf32>
    %17 = math.rsqrt %16 : vector<8x1xf32>
    %18 = vector.broadcast %17 : vector<8x1xf32> to vector<8x128xf32>
    %19 = arith.mulf %9, %18 : vector<8x128xf32>
    %20 = vector.broadcast %2 : vector<1x128xf32> to vector<8x128xf32>
    %21 = arith.mulf %19, %20 : vector<8x128xf32>
    %22 = vector.broadcast %3 : vector<1x128xf32> to vector<8x128xf32>
    %23 = arith.addf %21, %22 : vector<8x128xf32>
    %24 = arith.truncf %23 : vector<8x128xf32> to vector<8x128xbf16>
    %c0_10 = arith.constant 0 : index
    %c0_11 = arith.constant 0 : index
    %25 = vector.load %arg4[%c0_10, %c0_11] : memref<128x384xbf16, #tpu.memory_space<vmem>>, vector<128x384xbf16>
    %cst_12 = arith.constant dense<0.000000e+00> : vector<8x384xf32>
    %26 = tpu.matmul %24, %25, %cst_12 {dimension_numbers = #tpu.dot_dimension_numbers<[1], [0], [0], [1], [0, 0, 1, 1], [], []>} : vector<8x128xbf16>, vector<128x384xbf16>, vector<8x384xf32> -> vector<8x384xf32>
    %c0_13 = arith.constant 0 : index
    %c0_14 = arith.constant 0 : index
    %27 = vector.load %arg5[%c0_13, %c0_14] : memref<1x384xf32, #tpu.memory_space<vmem>>, vector<1x384xf32>
    %28 = vector.broadcast %27 : vector<1x384xf32> to vector<8x384xf32>
    %29 = arith.addf %26, %28 : vector<8x384xf32>
    %30 = arith.truncf %29 : vector<8x384xf32> to vector<8x384xbf16>
    %31 = vector.extract_strided_slice %30 {offsets = [0, 128], sizes = [8, 32], strides = [1, 1]} : vector<8x384xbf16> to vector<8x32xbf16>
    %32 = vector.extract_strided_slice %30 {offsets = [0, 256], sizes = [8, 32], strides = [1, 1]} : vector<8x384xbf16> to vector<8x32xbf16>
    %33 = vector.extract_strided_slice %30 {offsets = [0, 0], sizes = [8, 32], strides = [1, 1]} : vector<8x384xbf16> to vector<8x32xbf16>
    %cst_15 = arith.constant dense<0.000000e+00> : vector<8x8xf32>
    %34 = tpu.matmul %33, %31, %cst_15 {dimension_numbers = #tpu.dot_dimension_numbers<[1], [1], [0], [0], [0, 0, 1, 0], [], []>} : vector<8x32xbf16>, vector<8x32xbf16>, vector<8x8xf32> -> vector<8x8xf32>
    %cst_16 = arith.constant 0.176776692 : f32
    %35 = vector.broadcast %cst_16 : f32 to vector<8x8xf32>
    %36 = arith.mulf %34, %35 : vector<8x8xf32>
    %cst_17 = arith.constant dense<0xFF800000> : vector<8xf32>
    %37 = vector.multi_reduction <maximumf>, %36, %cst_17 [1] : vector<8x8xf32> to vector<8xf32>
    %38 = vector.shape_cast %37 : vector<8xf32> to vector<8x1xf32>
    %39 = vector.broadcast %38 : vector<8x1xf32> to vector<8x8xf32>
    %40 = arith.subf %36, %39 : vector<8x8xf32>
    %41 = math.exp %40 : vector<8x8xf32>
    %cst_18 = arith.constant dense<0.000000e+00> : vector<8xf32>
    %42 = vector.multi_reduction <add>, %41, %cst_18 [1] : vector<8x8xf32> to vector<8xf32>
    %43 = vector.shape_cast %42 : vector<8xf32> to vector<8x1xf32>
    %44 = tpu.reciprocal %43 {approx = true} : vector<8x1xf32> -> vector<8x1xf32>
    %45 = vector.broadcast %44 : vector<8x1xf32> to vector<8x8xf32>
    %46 = arith.mulf %41, %45 : vector<8x8xf32>
    %47 = arith.truncf %46 : vector<8x8xf32> to vector<8x8xbf16>
    %cst_19 = arith.constant dense<0.000000e+00> : vector<8x32xf32>
    %48 = tpu.matmul %47, %32, %cst_19 {dimension_numbers = #tpu.dot_dimension_numbers<[1], [0], [0], [1], [0, 0, 1, 1], [], []>} : vector<8x8xbf16>, vector<8x32xbf16>, vector<8x32xf32> -> vector<8x32xf32>
    %49 = arith.truncf %48 : vector<8x32xf32> to vector<8x32xbf16>
    %c0_20 = arith.constant 0 : index
    %c0_21 = arith.constant 0 : index
    %50 = vector.load %arg9[%c0_20, %c0_21] : memref<8x128xbf16, #tpu.memory_space<vmem>>, vector<8x32xbf16>
    tpu.vector_store %arg9[%c0_20, %c0_21], %49 {strides = array<i32>} : memref<8x128xbf16, #tpu.memory_space<vmem>>, vector<8x32xbf16>,
    %51 = vector.extract_strided_slice %30 {offsets = [0, 160], sizes = [8, 32], strides = [1, 1]} : vector<8x384xbf16> to vector<8x32xbf16>
    %52 = vector.extract_strided_slice %30 {offsets = [0, 288], sizes = [8, 32], strides = [1, 1]} : vector<8x384xbf16> to vector<8x32xbf16>
    %53 = vector.extract_strided_slice %30 {offsets = [0, 32], sizes = [8, 32], strides = [1, 1]} : vector<8x384xbf16> to vector<8x32xbf16>
    %cst_22 = arith.constant dense<0.000000e+00> : vector<8x8xf32>
    %54 = tpu.matmul %53, %51, %cst_22 {dimension_numbers = #tpu.dot_dimension_numbers<[1], [1], [0], [0], [0, 0, 1, 0], [], []>} : vector<8x32xbf16>, vector<8x32xbf16>, vector<8x8xf32> -> vector<8x8xf32>
    %cst_23 = arith.constant 0.176776692 : f32
    %55 = vector.broadcast %cst_23 : f32 to vector<8x8xf32>
    %56 = arith.mulf %54, %55 : vector<8x8xf32>
    %cst_24 = arith.constant dense<0xFF800000> : vector<8xf32>
    %57 = vector.multi_reduction <maximumf>, %56, %cst_24 [1] : vector<8x8xf32> to vector<8xf32>
    %58 = vector.shape_cast %57 : vector<8xf32> to vector<8x1xf32>
    %59 = vector.broadcast %58 : vector<8x1xf32> to vector<8x8xf32>
    %60 = arith.subf %56, %59 : vector<8x8xf32>
    %61 = math.exp %60 : vector<8x8xf32>
    %cst_25 = arith.constant dense<0.000000e+00> : vector<8xf32>
    %62 = vector.multi_reduction <add>, %61, %cst_25 [1] : vector<8x8xf32> to vector<8xf32>
    %63 = vector.shape_cast %62 : vector<8xf32> to vector<8x1xf32>
    %64 = tpu.reciprocal %63 {approx = true} : vector<8x1xf32> -> vector<8x1xf32>
    %65 = vector.broadcast %64 : vector<8x1xf32> to vector<8x8xf32>
    %66 = arith.mulf %61, %65 : vector<8x8xf32>
    %67 = arith.truncf %66 : vector<8x8xf32> to vector<8x8xbf16>
    %cst_26 = arith.constant dense<0.000000e+00> : vector<8x32xf32>
    %68 = tpu.matmul %67, %52, %cst_26 {dimension_numbers = #tpu.dot_dimension_numbers<[1], [0], [0], [1], [0, 0, 1, 1], [], []>} : vector<8x8xbf16>, vector<8x32xbf16>, vector<8x32xf32> -> vector<8x32xf32>
    %69 = arith.truncf %68 : vector<8x32xf32> to vector<8x32xbf16>
    %c0_27 = arith.constant 0 : index
    %c32 = arith.constant 32 : index
    %70 = vector.load %arg9[%c0_27, %c32] : memref<8x128xbf16, #tpu.memory_space<vmem>>, vector<8x32xbf16>
    tpu.vector_store %arg9[%c0_27, %c32], %69 {strides = array<i32>} : memref<8x128xbf16, #tpu.memory_space<vmem>>, vector<8x32xbf16>,
    %71 = vector.extract_strided_slice %30 {offsets = [0, 192], sizes = [8, 32], strides = [1, 1]} : vector<8x384xbf16> to vector<8x32xbf16>
    %72 = vector.extract_strided_slice %30 {offsets = [0, 320], sizes = [8, 32], strides = [1, 1]} : vector<8x384xbf16> to vector<8x32xbf16>
    %73 = vector.extract_strided_slice %30 {offsets = [0, 64], sizes = [8, 32], strides = [1, 1]} : vector<8x384xbf16> to vector<8x32xbf16>
    %cst_28 = arith.constant dense<0.000000e+00> : vector<8x8xf32>
    %74 = tpu.matmul %73, %71, %cst_28 {dimension_numbers = #tpu.dot_dimension_numbers<[1], [1], [0], [0], [0, 0, 1, 0], [], []>} : vector<8x32xbf16>, vector<8x32xbf16>, vector<8x8xf32> -> vector<8x8xf32>
    %cst_29 = arith.constant 0.176776692 : f32
    %75 = vector.broadcast %cst_29 : f32 to vector<8x8xf32>
    %76 = arith.mulf %74, %75 : vector<8x8xf32>
    %cst_30 = arith.constant dense<0xFF800000> : vector<8xf32>
    %77 = vector.multi_reduction <maximumf>, %76, %cst_30 [1] : vector<8x8xf32> to vector<8xf32>
    %78 = vector.shape_cast %77 : vector<8xf32> to vector<8x1xf32>
    %79 = vector.broadcast %78 : vector<8x1xf32> to vector<8x8xf32>
    %80 = arith.subf %76, %79 : vector<8x8xf32>
    %81 = math.exp %80 : vector<8x8xf32>
    %cst_31 = arith.constant dense<0.000000e+00> : vector<8xf32>
    %82 = vector.multi_reduction <add>, %81, %cst_31 [1] : vector<8x8xf32> to vector<8xf32>
    %83 = vector.shape_cast %82 : vector<8xf32> to vector<8x1xf32>
    %84 = tpu.reciprocal %83 {approx = true} : vector<8x1xf32> -> vector<8x1xf32>
    %85 = vector.broadcast %84 : vector<8x1xf32> to vector<8x8xf32>
    %86 = arith.mulf %81, %85 : vector<8x8xf32>
    %87 = arith.truncf %86 : vector<8x8xf32> to vector<8x8xbf16>
    %cst_32 = arith.constant dense<0.000000e+00> : vector<8x32xf32>
    %88 = tpu.matmul %87, %72, %cst_32 {dimension_numbers = #tpu.dot_dimension_numbers<[1], [0], [0], [1], [0, 0, 1, 1], [], []>} : vector<8x8xbf16>, vector<8x32xbf16>, vector<8x32xf32> -> vector<8x32xf32>
    %89 = arith.truncf %88 : vector<8x32xf32> to vector<8x32xbf16>
    %c0_33 = arith.constant 0 : index
    %c64 = arith.constant 64 : index
    %90 = vector.load %arg9[%c0_33, %c64] : memref<8x128xbf16, #tpu.memory_space<vmem>>, vector<8x32xbf16>
    tpu.vector_store %arg9[%c0_33, %c64], %89 {strides = array<i32>} : memref<8x128xbf16, #tpu.memory_space<vmem>>, vector<8x32xbf16>,
    %91 = vector.extract_strided_slice %30 {offsets = [0, 224], sizes = [8, 32], strides = [1, 1]} : vector<8x384xbf16> to vector<8x32xbf16>
    %92 = vector.extract_strided_slice %30 {offsets = [0, 352], sizes = [8, 32], strides = [1, 1]} : vector<8x384xbf16> to vector<8x32xbf16>
    %93 = vector.extract_strided_slice %30 {offsets = [0, 96], sizes = [8, 32], strides = [1, 1]} : vector<8x384xbf16> to vector<8x32xbf16>
    %cst_34 = arith.constant dense<0.000000e+00> : vector<8x8xf32>
    %94 = tpu.matmul %93, %91, %cst_34 {dimension_numbers = #tpu.dot_dimension_numbers<[1], [1], [0], [0], [0, 0, 1, 0], [], []>} : vector<8x32xbf16>, vector<8x32xbf16>, vector<8x8xf32> -> vector<8x8xf32>
    %cst_35 = arith.constant 0.176776692 : f32
    %95 = vector.broadcast %cst_35 : f32 to vector<8x8xf32>
    %96 = arith.mulf %94, %95 : vector<8x8xf32>
    %cst_36 = arith.constant dense<0xFF800000> : vector<8xf32>
    %97 = vector.multi_reduction <maximumf>, %96, %cst_36 [1] : vector<8x8xf32> to vector<8xf32>
    %98 = vector.shape_cast %97 : vector<8xf32> to vector<8x1xf32>
    %99 = vector.broadcast %98 : vector<8x1xf32> to vector<8x8xf32>
    %100 = arith.subf %96, %99 : vector<8x8xf32>
    %101 = math.exp %100 : vector<8x8xf32>
    %cst_37 = arith.constant dense<0.000000e+00> : vector<8xf32>
    %102 = vector.multi_reduction <add>, %101, %cst_37 [1] : vector<8x8xf32> to vector<8xf32>
    %103 = vector.shape_cast %102 : vector<8xf32> to vector<8x1xf32>
    %104 = tpu.reciprocal %103 {approx = true} : vector<8x1xf32> -> vector<8x1xf32>
    %105 = vector.broadcast %104 : vector<8x1xf32> to vector<8x8xf32>
    %106 = arith.mulf %101, %105 : vector<8x8xf32>
    %107 = arith.truncf %106 : vector<8x8xf32> to vector<8x8xbf16>
    %cst_38 = arith.constant dense<0.000000e+00> : vector<8x32xf32>
    %108 = tpu.matmul %107, %92, %cst_38 {dimension_numbers = #tpu.dot_dimension_numbers<[1], [0], [0], [1], [0, 0, 1, 1], [], []>} : vector<8x8xbf16>, vector<8x32xbf16>, vector<8x32xf32> -> vector<8x32xf32>
    %109 = arith.truncf %108 : vector<8x32xf32> to vector<8x32xbf16>
    %c0_39 = arith.constant 0 : index
    %c96 = arith.constant 96 : index
    %110 = vector.load %arg9[%c0_39, %c96] : memref<8x128xbf16, #tpu.memory_space<vmem>>, vector<8x32xbf16>
    tpu.vector_store %arg9[%c0_39, %c96], %109 {strides = array<i32>} : memref<8x128xbf16, #tpu.memory_space<vmem>>, vector<8x32xbf16>,
    %c0_40 = arith.constant 0 : index
    %c0_41 = arith.constant 0 : index
    %111 = vector.load %arg9[%c0_40, %c0_41] : memref<8x128xbf16, #tpu.memory_space<vmem>>, vector<8x128xbf16>
    %c0_42 = arith.constant 0 : index
    %c0_43 = arith.constant 0 : index
    %112 = vector.load %arg6[%c0_42, %c0_43] : memref<128x128xbf16, #tpu.memory_space<vmem>>, vector<128x128xbf16>
    %cst_44 = arith.constant dense<0.000000e+00> : vector<8x128xf32>
    %113 = tpu.matmul %111, %112, %cst_44 {dimension_numbers = #tpu.dot_dimension_numbers<[1], [0], [0], [1], [0, 0, 1, 1], [], []>} : vector<8x128xbf16>, vector<128x128xbf16>, vector<8x128xf32> -> vector<8x128xf32>
    %c0_45 = arith.constant 0 : index
    %c0_46 = arith.constant 0 : index
    %114 = vector.load %arg7[%c0_45, %c0_46] : memref<1x128xf32, #tpu.memory_space<vmem>>, vector<1x128xf32>
    %115 = vector.broadcast %114 : vector<1x128xf32> to vector<8x128xf32>
    %116 = arith.addf %113, %115 : vector<8x128xf32>
    %117 = arith.addf %116, %1 : vector<8x128xf32>
    %c0_47 = arith.constant 0 : index
    %c0_48 = arith.constant 0 : index
    %c0_49 = arith.constant 0 : index
    %118 = vector.load %arg8[%c0_47, %c0_48, %c0_49] : memref<1x8x128xf32, #tpu.memory_space<vmem>>, vector<1x8x128xf32>
    %119 = vector.shape_cast %118 : vector<1x8x128xf32> to vector<8x128xf32>
    %120 = vector.shape_cast %117 : vector<8x128xf32> to vector<1x8x128xf32>
    tpu.vector_store %arg8[%c0_47, %c0_48, %c0_49], %120 {strides = array<i32>} : memref<1x8x128xf32, #tpu.memory_space<vmem>>, vector<1x8x128xf32>,
    return
  }
  func.func @transform_0(%arg0: i32) -> (i32, i32, i32) {
    %c0_i32 = arith.constant 0 : i32
    %c0_i32_0 = arith.constant 0 : i32
    %c0_i32_1 = arith.constant 0 : i32
    return %arg0, %c0_i32, %c0_i32_0 : i32, i32, i32
  }
  func.func @transform_1(%arg0: i32) -> (i32, i32) {
    %c0_i32 = arith.constant 0 : i32
    %c0_i32_0 = arith.constant 0 : i32
    %c0_i32_1 = arith.constant 0 : i32
    return %c0_i32, %c0_i32_0 : i32, i32
  }
  func.func @transform_2(%arg0: i32) -> (i32, i32) {
    %c0_i32 = arith.constant 0 : i32
    %c0_i32_0 = arith.constant 0 : i32
    %c0_i32_1 = arith.constant 0 : i32
    return %c0_i32, %c0_i32_0 : i32, i32
  }
  func.func @transform_3(%arg0: i32) -> (i32, i32) {
    %c0_i32 = arith.constant 0 : i32
    %c0_i32_0 = arith.constant 0 : i32
    %c0_i32_1 = arith.constant 0 : i32
    return %c0_i32, %c0_i32_0 : i32, i32
  }
  func.func @transform_4(%arg0: i32) -> (i32, i32) {
    %c0_i32 = arith.constant 0 : i32
    %c0_i32_0 = arith.constant 0 : i32
    %c0_i32_1 = arith.constant 0 : i32
    return %c0_i32, %c0_i32_0 : i32, i32
  }
  func.func @transform_5(%arg0: i32) -> (i32, i32) {
    %c0_i32 = arith.constant 0 : i32
    %c0_i32_0 = arith.constant 0 : i32
    %c0_i32_1 = arith.constant 0 : i32
    return %c0_i32, %c0_i32_0 : i32, i32
  }
  func.func @transform_6(%arg0: i32) -> (i32, i32) {
    %c0_i32 = arith.constant 0 : i32
    %c0_i32_0 = arith.constant 0 : i32
    %c0_i32_1 = arith.constant 0 : i32
    return %c0_i32, %c0_i32_0 : i32, i32
  }
  func.func @transform_7(%arg0: i32) -> (i32, i32, i32) {
    %c0_i32 = arith.constant 0 : i32
    %c0_i32_0 = arith.constant 0 : i32
    %c0_i32_1 = arith.constant 0 : i32
    return %arg0, %c0_i32, %c0_i32_0 : i32, i32, i32
  }
}

</mosaic_0001>

<bundles_post_ra>
// kernel: tpu_custom_call.1
= control target key start
LH: loop header
LB: loop body
LE: loop exit
PB: predicated region body
PF: predicated region fallthrough
CT: control target
= control target key end

     0   :  { %12 = vsyncpa [#allocation4], 0  ;;  %s2176_s0 = inlined_call_operand.hbm [shape: f32[2,8,128], index: 0, kind: input, shape index: {}]   ;;  %s2177_s1 = inlined_call_operand.vmem [shape: f32[1,128], index: 1, kind: input, shape index: {}]   ;;  %s2178_s2 = inlined_call_operand.vmem [shape: f32[1,128], index: 2, kind: input, shape index: {}]   ;;  %s2179_s3 = inlined_call_operand.hbm [shape: bf16[128,384], index: 3, kind: input, shape index: {}]   ;;  %s2180_s4 = inlined_call_operand.vmem [shape: f32[1,384], index: 4, kind: input, shape index: {}]   ;;  %s2181_s5 = inlined_call_operand.hbm [shape: bf16[128,128], index: 5, kind: input, shape index: {}]   ;;  %s2182_s6 = inlined_call_operand.vmem [shape: f32[1,128], index: 6, kind: input, shape index: {}]   ;;  %s2183_s7 = inlined_call_operand.hbm [shape: f32[2,8,128], index: 7, kind: output, shape index: {}]  }
   0x1   :  { %14 = vsyncpa [#allocation4 + $0x1], 0 }
   0x2   :  { %15 = vsyncpa [#allocation7], 0 }
   0x3   :  { %16 = vsyncpa [#allocation5], 0 }
   0x4   :  { %18 = vsyncpa [#allocation5 + $0x1], 0  ;;  %s1840_s24 = smov 0   ;;  %s1842_s25 = smov 0  }
   0x5   :  { %s1844_s26 = smov 0   ;;  %s1846_s27 = smov 0  }
   0x6 LB: > { %s1861_s28 = sadd.s32 4294967295, %s1784_s27   ;;  %s1306_s29 = sadd.s32 4294967294, %s1784_s27   ;;  %s1784_s27 = sphi %s1846_s27, %s2203_s27   ;;  %s1780_s26 = sphi %s1844_s26, %s2202_s26   ;;  %s1776_s25 = sphi %s1842_s25, %s2201_s25   ;;  %s1772_s24 = sphi %s1840_s24, %s2200_s24  }
   0x7   : > { %p44_p0 = scmp.ne.s32.totalorder %s1776_s25, %s1772_s24  ;;  %p2184_p1 = scmp.eq.s32.totalorder %s1861_s28, 0 }
   0x8   : > { %p200_p3 = scmp.eq.s32.totalorder %s1306_s29, 1  ;;  %p1307_p5 = scmp.ge.s32.totalorder %s1784_s27, 1 }
   0x9   : > { %p1870_p4 = por %p2184_p1, %p44_p0  ;;  %p207_p7 = scmp.lt.s32.totalorder %s1784_s27, 3 }
   0xa   : > { %p1875_p6 = por %p200_p3, %p44_p0  ;;  %s1786_s10 = smov [#allocation6]  }
   0xb   : > { %s2187_s30 = scalar_select %p1870_p4, 1, 0 }
   0xc   : > { %s2188_s8 = scalar_select %p1875_p6, 1, 0 }
   0xd   : > { %p1880_p8 = pnand %p1307_p5, %p207_p7  ;;  %s225_s11 = sshll.u32 %s1786_s10, 4  ;;  %s1884_s11 = int_to_ptr.vmem [resolvable:$true] %s225_s11 }
   0xe   : > { %s1787_s13 = smov [#allocation8]   ;;  %s1628_s17 = scalar_lea.hbm %s2179_s3, 3072 }
   0xf   : > { %p1505_p9 = pneg %p1880_p8  ;;  %s241_s14 = sshll.u32 %s1787_s13, 4  ;;  %s1895_s14 = int_to_ptr.vmem [resolvable:$true] %s241_s14 }
  0x10   : > { %p1629_p12 = scmp.ne.s32.totalorder %s2179_s3, %s1628_s17  ;;  %p1635_p5 = scmp.lt.u32.totalorder %s1628_s17, %s2179_s3 }
  0x11   : > { %p1891_p11 = pnand %p1505_p9, %p2184_p1 }
  0x13   : > { %p1630_p13 = pneg %p1891_p11 }
  0x15   : > { %p1631_p0 = pnand %p1630_p13, %p1629_p12 }
  0x17   : > { %p1632_p3 = pneg %p1631_p0 }
  0x19   : > { %p1637_p7 = pnand %p1635_p5, %p1632_p3 }
  0x1b   : > { %1640 = shalt.err (!%p1637_p7)
}
  0x1c   : > { %s1641_s22 = scalar_lea.vmem %s1884_s11, 3072  ;;  %p1649_p2 = scmp.lt.s32.totalorder %s1884_s11, %s1884_s11 }
  0x1d   : > { %p1642_p9 = scmp.ne.s32.totalorder %s1884_s11, %s1641_s22  ;;  %p1650_p12 = scmp.lt.s32.totalorder %s1641_s22, %s1641_s22 }
  0x1f   : > { %p1644_p10 = pnand %p1642_p9, %p1630_p13  ;;  %p1651_p0 = por %p1650_p12, %p1649_p2 }
  0x21   : > { %p1645_p1 = pneg %p1644_p10 }
  0x23   : > { %p1652_p6 = pnand %p1651_p0, %p1645_p1 }
  0x25   : > { %1655 = shalt.err (!%p1652_p6)
}
  0x26   : > { %s1788_s23 = smov 192   ;;  %s1789_s29 = smov 12  }
  0x27   : > { %1508 = dma.hbm_to_vmem [thread:$0]  (!%p1891_p11), %s2179_s3, 3072, %s1884_s11, [#allocation7], %s1788_s23, %s1788_s23, %s1789_s29  }
  0x28   : > { %s1656_s17 = scalar_lea.hbm %s2181_s5, 1024 }
  0x29   : > { %p1657_p2 = scmp.ne.s32.totalorder %s2181_s5, %s1656_s17  ;;  %p1663_p10 = scmp.lt.u32.totalorder %s1656_s17, %s2181_s5 }
  0x2b   : > { %p1659_p1 = pnand %p1657_p2, %p1630_p13 }
  0x2d   : > { %p1660_p6 = pneg %p1659_p1 }
  0x2f   : > { %p1665_p3 = pnand %p1663_p10, %p1660_p6 }
  0x31   : > { %1668 = shalt.err (!%p1665_p3)
}
  0x32   : > { %s1669_s11 = scalar_lea.vmem %s1895_s14, 1024  ;;  %p1677_p12 = scmp.lt.s32.totalorder %s1895_s14, %s1895_s14 }
  0x33   : > { %p1670_p5 = scmp.ne.s32.totalorder %s1895_s14, %s1669_s11  ;;  %p1678_p0 = scmp.lt.s32.totalorder %s1669_s11, %s1669_s11 }
  0x35   : > { %p1672_p7 = pnand %p1670_p5, %p1630_p13  ;;  %p1679_p2 = por %p1678_p0, %p1677_p12 }
  0x37   : > { %p1673_p9 = pneg %p1672_p7 }
  0x39   : > { %p1680_p1 = pnand %p1679_p2, %p1673_p9 }
  0x3b   : > { %1683 = shalt.err (!%p1680_p1)
}
  0x3c   : > { %s1790_s22 = smov 64   ;;  %s1791_s23 = smov 4  }
  0x3d   : > { %1511 = dma.hbm_to_vmem [thread:$0]  (!%p1891_p11), %s2181_s5, 1024, %s1895_s14, [#allocation7], %s1790_s22, %s1790_s22, %s1791_s23  }
  0x3e   : > { %s1950_s13 = sadd.s32 1, %s1784_s27   ;;  %s31_s16 = sadd.s32 1, %s1780_s26 }
  0x3f   : > { %s28_s15 = ssub.s32 %s1784_s27, %s1950_s13  ;;  %p38_p6 = scmp.ne.s32.totalorder %s1780_s26, %s1776_s25 }
  0x40   : > { %p29_p13 = scmp.eq.s32.totalorder %s28_s15, 0  ;;  %p39_p10 = scmp.eq.s32.totalorder %s1784_s27, 0 }
  0x41   : > { %p2191_p5 = scmp.eq.s32.totalorder %s1861_s28, 1  ;;  %p1522_p9 = scmp.lt.s32.totalorder %s1784_s27, 2 }
  0x42   : > { %s1959_s17 = scalar_select %p29_p13, %s1780_s26, %s31_s16  }
  0x43   : > { %p40_p3 = por %p39_p10, %p38_p6  ;;  %p1963_p7 = por %p2191_p5, %p38_p6 }
  0x44   : > { %s258_s12 = sand.u32 1, %s1780_s26   ;;  %s1312_s14 = sshll.u32 %s1784_s27, 7 }
  0x45   : > { %s2192_s18 = scalar_select %p1963_p7, 1, 0 }
  0x46   : > { %s1311_s19 = sshll.u32 %s258_s12, 3  ;;  %s1973_s11 = scalar_lea.hbm %s2176_s0, %s1312_s14 }
  0x47   : > { %s262_s22 = scalar_lea.vmem [#allocation3], %s1311_s19  ;;  %p1977_p11 = pnand %p1522_p9, %p40_p3 }
  0x48   : > { %s269_s23 = sshll.u32 %s262_s22, 4  ;;  %s259_s10 = scalar_lea.sflag [#allocation4], %s258_s12  ;;  %s1975_s23 = int_to_ptr.vmem [resolvable:$true] %s269_s23 }
  0x49   : > { %s1684_s15 = scalar_lea.hbm %s1973_s11, 128  ;;  %p1686_p0 = pneg %p1977_p11 }
  0x4a   : > { %p1685_p12 = scmp.ne.s32.totalorder %s1973_s11, %s1684_s15  ;;  %s1689_s14 = scalar_lea.hbm %s2176_s0, 256 }
  0x4b   : > { %p1690_p13 = scmp.lt.u32.totalorder %s1973_s11, %s2176_s0  ;;  %p1691_p6 = scmp.lt.u32.totalorder %s1689_s14, %s1684_s15 }
  0x4c   : > { %p1687_p2 = pnand %p1686_p0, %p1685_p12  ;;  %p1693_p3 = scmp.lt.u32.totalorder %s1684_s15, %s1973_s11 }
  0x4d   : > { %p1692_p10 = por %p1691_p6, %p1690_p13 }
  0x4e   : > { %p1688_p1 = pneg %p1687_p2 }
  0x4f   : > { %p1694_p5 = por %p1693_p3, %p1692_p10 }
  0x51   : > { %p1695_p9 = pnand %p1694_p5, %p1688_p1 }
  0x53   : > { %1698 = shalt.err (!%p1695_p9)
}
  0x54   : > { %s1699_s12 = scalar_lea.vmem %s1975_s23, 128  ;;  %s1792_s22 = smov [#allocation3]  }
  0x55   : > { %p1700_p12 = scmp.ne.s32.totalorder %s1975_s23, %s1699_s12  ;;  %s1704_s16 = sshll.u32 %s1792_s22, 4  ;;  %s1705_s16 = int_to_ptr.vmem [resolvable:$false] %s1704_s16 }
  0x56   : > { %s1706_s19 = scalar_lea.vmem %s1705_s16, 256  ;;  %p1707_p4 = scmp.lt.s32.totalorder %s1975_s23, %s1705_s16 }
  0x57   : > { %p1702_p2 = pnand %p1700_p12, %p1686_p0  ;;  %p1708_p13 = scmp.lt.s32.totalorder %s1706_s19, %s1699_s12 }
  0x59   : > { %p1703_p7 = pneg %p1702_p2  ;;  %p1709_p6 = por %p1708_p13, %p1707_p4 }
  0x5b   : > { %p1710_p10 = pnand %p1709_p6, %p1703_p7 }
  0x5d   : > { %1713 = shalt.err (!%p1710_p10)
}
  0x5e   : > { %1515 = dma.hbm_to_vmem [thread:$0]  (!%p1977_p11), %s1973_s11, 128, %s1975_s23, %s259_s10  }
  0x5f   : > { %278 = sbr.rel (%p1880_p8) target bundleno = 2296 (0x8f8), region = 48  ;;  %s2009_s15 = sand.u32 (!%p1880_p8), 1, %s1776_s25  }
  0x60   : > { %s1314_s14 = sshll.u32 (!%p1880_p8), %s2009_s15, 3  ;;  %s281_s20 = scalar_lea.sflag (!%p1880_p8), [#allocation4], %s2009_s15 }
  0x61   : > { %s284_s21 = scalar_lea.vmem (!%p1880_p8), [#allocation3], %s1314_s14  ;;  %p2194_p4 = scmp.ne.s32.totalorder (!%p1880_p8), %s2187_s30, 0 }
  0x66   : > { %1759 = dma.done.wait (%p2194_p4), %s281_s20, 128  }
  0x67   : > { %1761 = vsyncadd (%p2194_p4), %s281_s20, 4294967168  ;;  %p2195_p7 = scmp.eq.s32.totalorder %s1861_s28, 0 }
  0x69   : > { %1763 = dma.done.wait (%p2195_p7), [#allocation7], 4096   ;;  %p2196_p8 = pmov %p2195_p7 }
  0x6a   : > { %v2023_v0 = vld [vmem:[%s284_s21] sm:$0xff]  ;;  %v1572_v2 = vld [vmem:[#allocation6] ss:$12 sps:$4 sm:$0xff]   ;;  %v1793_v3 = vmov 0.0   ;;  %v1794_v25 = vmov 0   ;;  %vm1795_vm0 = vmmov 0   ;;  %v388_v41 = vlaneseq }
  0x6b   : > { %1765 = vsyncadd (%p2196_p8), [#allocation7], 4294963200  ;;  %327 = vadd.xlane.f32.xlu0 %v2023_v0  ;;  %v1570_v1 = vld [vmem:[#allocation6 + $0x4] ss:$12 sps:$4 sm:$0xff]   ;;  %1405 = vmatprep.subr.bf16.mxu1 %v1793_v3  ;;  %v1573_v4 = vld [vmem:[#allocation6 + $0x8] ss:$12 sps:$4 sm:$0xff]  }
  0x6c   : > { %v1574_v5 = vld [vmem:[#allocation6 + $0x1c] ss:$12 sps:$4 sm:$0xff]   ;;  %531 = vmatprep.subr.bf16.mxu0 %v1570_v1  ;;  %1406 = vmatpush3.bf16.msra.mxu1 %v1573_v4  ;;  %v1576_v6 = vld [vmem:[#allocation6 + $0x18] ss:$12 sps:$4 sm:$0xff]   ;;  %v1577_v7 = vld [vmem:[#allocation6 + $0x20] ss:$12 sps:$4 sm:$0xff]  }
  0x6d   : > { %532 = vmatpush1.bf16.msra.mxu0 %v1572_v2  ;;  %1407 = vmatprep.subr.bf16.mxu1 %v1793_v3  ;;  %v1578_v8 = vld [vmem:[#allocation6 + $0x34] ss:$12 sps:$4 sm:$0xff]   ;;  %v1580_v13 = vld [vmem:[#allocation6 + $0x30] ss:$12 sps:$4 sm:$0xff]   ;;  %v1581_v14 = vld [vmem:[#allocation6 + $0x38] ss:$12 sps:$4 sm:$0xff]  }
  0x6e   : > { %533 = vmatprep.subr.bf16.mxu0 %v1574_v5  ;;  %v1582_v15 = vld [vmem:[#allocation6 + $0x4c] ss:$12 sps:$4 sm:$0xff]   ;;  %v1584_v16 = vld [vmem:[#allocation6 + $0x48] ss:$12 sps:$4 sm:$0xff]   ;;  %v1585_v17 = vld [vmem:[#allocation6 + $0x50] ss:$12 sps:$4 sm:$0xff]   ;;  %563 = vmatprep.mubr.bf16.mxu0 %v1794_v25 }
  0x6f   : > { %v1586_v18 = vld [vmem:[#allocation6 + $0x64] ss:$12 sps:$4 sm:$0xff]   ;;  %v1588_v19 = vld [vmem:[#allocation6 + $0x60] ss:$12 sps:$4 sm:$0xff]   ;;  %v1589_v20 = vld [vmem:[#allocation6 + $0x68] ss:$12 sps:$4 sm:$0xff]   ;;  %1421 = vmatprep.mubr.msk.bf16.mxu1 %vm1795_vm0, %v1793_v3 }
  0x70   : > { %1408 = vmatpush3.bf16.msra.mxu1 %v1577_v7  ;;  %v1590_v21 = vld [vmem:[#allocation6 + $0x7c] ss:$12 sps:$4 sm:$0xff]   ;;  %v1592_v22 = vld [vmem:[#allocation6 + $0x78] ss:$12 sps:$4 sm:$0xff]   ;;  %v1593_v23 = vld [vmem:[#allocation6 + $0x80] ss:$12 sps:$4 sm:$0xff]  }
  0x71   : > { %534 = vmatpush1.bf16.msra.mxu0 %v1576_v6  ;;  %1409 = vmatprep.subr.bf16.mxu1 %v1793_v3  ;;  %v1594_v24 = vld [vmem:[#allocation6 + $0x94] ss:$12 sps:$4 sm:$0xff]   ;;  %v1596_v26 = vld [vmem:[#allocation6 + $0x90] ss:$12 sps:$4 sm:$0xff]   ;;  %v1597_v27 = vld [vmem:[#allocation6 + $0x98] ss:$12 sps:$4 sm:$0xff]  }
  0x72   : > { %535 = vmatprep.subr.bf16.mxu0 %v1578_v8  ;;  %v1598_v28 = vld [vmem:[#allocation6 + $0xac] ss:$12 sps:$4 sm:$0xff]   ;;  %v1600_v29 = vld [vmem:[#allocation6 + $0xa8] ss:$12 sps:$4 sm:$0xff]   ;;  %v1601_v30 = vld [vmem:[#allocation6 + $0xb0] ss:$12 sps:$4 sm:$0xff]  }
  0x73   : > { %v1318_v35 = vld [vmem:[%s2177_s1] ss:$0 sm:$0xff]  ;;  %v389_v42 = vshrl.u32 %v388_v41, 7  ;;  %vm615_vm1 = vcmask 261120   ;;  %s1796_s12 = smov 96   ;;  %s1797_s22 = smov 32  }
  0x74   : > { %1410 = vmatpush3.bf16.msra.mxu1 %v1581_v14  ;;  %v1319_v37 = vld [vmem:[%s2178_s2] ss:$0 sm:$0xff]  ;;  %vm679_vm2 = vcmask 1043456   ;;  %vm663_vm3 = vcmask 64512   ;;  %s1798_s16 = smov 64   ;;  %vm724_vm4 = vcmask 257024  }
  0x75   : > { %536 = vmatpush1.bf16.msra.mxu0 %v1580_v13  ;;  %1411 = vmatprep.subr.bf16.mxu1 %v1793_v3  ;;  %v394_v43 = vsub.s32 1, %v389_v42  ;;  %v386_v44 = vld [vmem:[%s2180_s4] sm:$0x7]  ;;  %v398_v45 = vsub.s32 2, %v389_v42  ;;  %v390_v47 = vsub.s32 0, %v389_v42  ;;  %vm847_vm5 = vcmask 519424  }
  0x76   : > { %537 = vmatprep.subr.bf16.mxu0 %v1582_v15  ;;  %vm967_vm6 = vcmask 781824   ;;  %vm1087_vm7 = vcmask 1044224   ;;  %s1365_s21 = sshll.u32 %s1861_s28, 7  ;;  %s322_s30 = scalar_lea.vmem [#allocation9], %s1314_s14 }
  0x77   : > { %v395_v46 = vrot.slane %v386_v44, %v394_v43  ;;  %v399_v52 = vrot.slane %v386_v44, %v398_v45  ;;  %v391_v58 = vrot.slane %v386_v44, %v390_v47  ;;  %s1217_s9 = sshll.u32 %s322_s30, 4  ;;  %s2132_s29 = scalar_lea.hbm %s2183_s7, %s1365_s21  ;;  %s2134_s9 = int_to_ptr.vmem [resolvable:$true] %s1217_s9 }
  0x78   : > { %1412 = vmatpush3.bf16.msra.mxu1 %v1585_v17  ;;  %s1204_s28 = scalar_lea.sflag [#allocation5], %s2009_s15  ;;  %s1714_s14 = scalar_lea.vmem %s2134_s9, 128 }
  0x79   : > { %538 = vmatpush1.bf16.msra.mxu0 %v1584_v16  ;;  %1413 = vmatprep.subr.bf16.mxu1 %v1793_v3  ;;  %p1715_p11 = scmp.ne.s32.totalorder %s2134_s9, %s1714_s14  ;;  %p2197_p0 = scmp.ne.s32.totalorder %s2192_s18, 0 }
  0x7a   : > { %539 = vmatprep.subr.bf16.mxu0 %v1586_v18  ;;  %s1799_s10 = smov [#allocation9]  }
  0x7b   : > { %p1716_p1 = pnand %p1715_p11, %p2197_p0 }
  0x7c   : > { %1414 = vmatpush3.bf16.msra.mxu1 %v1589_v20 }
  0x7d   : > { %540 = vmatpush1.bf16.msra.mxu0 %v1588_v19  ;;  %1415 = vmatprep.subr.bf16.mxu1 %v1793_v3  ;;  %p1717_p3 = pneg %p1716_p1 }
  0x7e   : > { %541 = vmatprep.subr.bf16.mxu0 %v1590_v21 }
  0x80   : > { %1416 = vmatpush3.bf16.msra.mxu1 %v1593_v23 }
  0x81   : > { %542 = vmatpush1.bf16.msra.mxu0 %v1592_v22  ;;  %1417 = vmatprep.subr.bf16.mxu1 %v1793_v3 }
  0x82   : > { %543 = vmatprep.subr.bf16.mxu0 %v1594_v24 }
  0x84   : > { %1418 = vmatpush3.bf16.msra.mxu1 %v1597_v27 }
  0x85   : > { %544 = vmatpush1.bf16.msra.mxu0 %v1596_v26  ;;  %1419 = vmatprep.subr.bf16.mxu1 %v1793_v3 }
  0x86   : > { %545 = vmatprep.subr.bf16.mxu0 %v1598_v28 }
  0x88   : > { %1420 = vmatpush3.bf16.msra.mxu1 %v1601_v30 }
  0x89   : > { %546 = vmatpush1.bf16.msra.mxu0 %v1600_v29  ;;  %1425 = vmatprep.subr.bf16.mxu1 %v1793_v3 }
  0x8a   : > { %1449 = vmatprep.subr.bf16.mxu0 %v1793_v3 }
  0xf8   : > { %v328_v9 = vpop.xlane.xlu0 %327 }
  0xf9   : > { %v330_v10 = vmul.f32 0.0078125, %v328_v9 }
  0xfb   : > { %v331_v11 = vsub.f32 %v2023_v0, %v330_v10 }
  0xfd   : > { %v332_v12 = vmul.f32 %v331_v11, %v331_v11 }
  0xff   : > { %333 = vadd.xlane.f32.xlu0 %v332_v12 }
 0x18c   : > { %v334_v31 = vpop.xlane.xlu0 %333 }
 0x18d   : > { %v335_v32 = vmul.f32 0.0078125, %v334_v31 }
 0x18f   : > { %v336_v33 = vadd.f32 1e-06, %v335_v32 }
 0x191   : > { %1610 = vrsqrt.f32 %v336_v33 }
 0x19b   : > { %v1611_v34 = vpop.eup %1610 }
 0x19c   : > { %v338_v36 = vmul.f32 %v1611_v34, %v331_v11 }
 0x19e   : > { %v345_v38 = vmul.f32 %v1318_v35, %v338_v36 }
 0x1a0   : > { %v352_v39 = vadd.f32 %v1319_v37, %v345_v38 }
 0x1a2   : > { %v353_v40 = vpack.c.bf16 %v352_v39, %v352_v39 }
 0x1a4   : > { %564 = vmatmul.mubr.bf16.vlgmr.msra.gmra.mrb[0].mxu0 %v353_v40  ;;  %1422 = vmatmul.mubr.bf16.vlgmr.msra.gmra.mrb[0].mxu1 %v353_v40 }
 0x1a5   : > { %1427 = vmatprep.mubr.msk.bf16.mxu1 %vm1795_vm0, %v1793_v3  ;;  %1451 = vmatprep.mubr.msk.bf16.mxu0 %vm1795_vm0, %v1793_v3 }
 0x277   : > { %v565_v48 = vpop.f32.mrb[0].mxu0  ;;  %v606_v49 = vpop.f32.mrb[0].mxu1 }
 0x278   : > { %v567_v50 = vpop.f32.mrb[1].mxu0  ;;  %v1423_v51 = vpop.f32.mrb[1].mxu1  ;;  %v607_v60 = vadd.f32 %v606_v49, %v399_v52  ;;  %v566_v62 = vadd.f32 %v565_v48, %v391_v58 }
 0x279   : > { %v568_v53 = vadd.f32 %v567_v50, %v395_v46  ;;  %v569_v54 = vpop.f32.mrb[2].mxu0  ;;  %v609_v55 = vpop.f32.mrb[2].mxu1 }
 0x27a   : > { %v570_v56 = vpop.f32.mrb[3].mxu0  ;;  %v1424_v57 = vpop.f32.mrb[3].mxu1  ;;  %v2055_v63 = vpack.c.bf16 %v607_v60, %v607_v60  ;;  %v612_v1 = vpack.c.bf16 %v566_v62, %v566_v62 }
 0x27b   : > { %v613_v59 = vpack.c.bf16 %v568_v53, %v568_v53 }
 0x27c   : > { %v681_v2 = vsel %vm679_vm2, %v2055_v63, 0 }
 0x27d   : > { %730 = vrot.lane.b32.xlu0 %v613_v59, %s1796_s12  ;;  %v620_v61 = vsel %vm615_vm1, %v613_v59, 0 }
 0x27e   : > { %1426 = vmatpush3.bf16.xpose.msra.mxu1 %v620_v61 }
 0x27f   : > { %1431 = vmatprep.subr.bf16.mxu1 %v1793_v3 }
 0x281   : > { %971 = vrot.lane.b32.xlu0 %v613_v59, %s1797_s22 }
 0x285   : > { %1428 = vmatmul.mubr.msk.bf16.vlgmr.msra.gmra.mrb[4].mxu1 %vm615_vm1, %v612_v1 }
 0x286   : > { %1432 = vmatpush3.bf16.msra.mxu1 %v681_v2  ;;  %1433 = vmatprep.mubr.msk.bf16.mxu1 %vm1795_vm0, %v1793_v3 }
 0x287   : > { %1437 = vmatprep.subr.bf16.mxu1 %v1793_v3 }
 0x2ef   : > { %v731_v17 = vpop.permute.xlu0 %730 }
 0x2f0   : > { %v736_v24 = vsel %vm615_vm1, %v731_v17, 0 }
 0x2f3   : > { %v972_v22 = vpop.permute.xlu0 %971 }
 0x2f4   : > { %v977_v26 = vsel %vm615_vm1, %v972_v22, 0  ;;  %v1602_v22 = vld [vmem:[#allocation8] sm:$0xff]  }
 0x358   : > { %v656_v4 = vpop.f32.mrb[4].mxu1 }
 0x359   : > { %v662_v5 = vmul.f32 0.17677669, %v656_v4  ;;  %v1429_v6 = vpop.f32.mrb[5].mxu1 }
 0x35a   : > { %v659_v7 = vpop.f32.mrb[6].mxu1 }
 0x35b   : > { %v1430_v8 = vpop.f32.mrb[7].mxu1  ;;  %v664_v9 = vsel %vm663_vm3, %v662_v5, -inf }
 0x35c   : > { %665 = vmax.xlane.f32.xlu1 %v664_v9 }
 0x3e9   : > { %v666_v10 = vpop.xlane.xlu1 %665 }
 0x3ea   : > { %v667_v11 = vsub.f32 %v662_v5, %v666_v10 }
 0x3ec   : > { %v668_v12 = vmul.f32 1.442695, %v667_v11 }
 0x3ee   : > { %1612 = vpow2.f32 %v668_v12 }
 0x3f8   : > { %v1613_v13 = vpop.eup %1612 }
 0x3f9   : > { %v670_v14 = vsel %vm663_vm3, %v1613_v13, 0.0 }
 0x3fa   : > { %671 = vadd.xlane.f32.xlu1 %v670_v14 }
 0x40b   : > { %727 = vrot.lane.b32.xlu1 %v612_v1, %s1796_s12 }
 0x40f   : > { %851 = vrot.lane.b32.xlu1 %v613_v59, %s1798_s16 }
 0x413   : > { %849 = vrot.lane.b32.xlu1 %v612_v1, %s1798_s16 }
 0x417   : > { %969 = vrot.lane.b32.xlu1 %v612_v1, %s1797_s22 }
 0x487   : > { %v672_v15 = vpop.xlane.xlu1 %671 }
 0x488   : > { %1614 = vrcp.f32 %v672_v15 }
 0x48b   : > { %v728_v16 = vpop.permute.xlu1 %727 }
 0x48f   : > { %v852_v18 = vpop.permute.xlu1 %851 }
 0x490   : > { %v857_v19 = vsel %vm615_vm1, %v852_v18, 0 }
 0x491   : > { %1450 = vmatpush3.bf16.xpose.msra.mxu0 %v857_v19 }
 0x492   : > { %v1615_v20 = vpop.eup %1614  ;;  %1461 = vmatprep.subr.bf16.mxu0 %v1793_v3 }
 0x493   : > { %v674_v21 = vmul.f32 %v1615_v20, %v1613_v13  ;;  %v850_v25 = vpop.permute.xlu1 %849 }
 0x495   : > { %v675_v23 = vpack.c.bf16 %v674_v21, %v674_v21 }
 0x497   : > { %1434 = vmatmul.mubr.msk.bf16.vlgmr.msra.gmra.mrb[8].mxu1 %vm663_vm3, %v675_v23  ;;  %v970_v27 = vpop.permute.xlu1 %969  ;;  %v1603_v23 = vld [vmem:[#allocation8 + $0x8] sm:$0xff]  }
 0x498   : > { %1438 = vmatpush3.bf16.xpose.msra.mxu1 %v736_v24  ;;  %1452 = vmatmul.mubr.msk.bf16.vlgmr.msra.gmra.mrb[4].mxu0 %vm615_vm1, %v850_v25  ;;  %v1604_v24 = vld [vmem:[#allocation8 + $0x10] sm:$0xff]   ;;  %v1605_v25 = vld [vmem:[#allocation8 + $0x18] sm:$0xff]  }
 0x499   : > { %1462 = vmatpush3.bf16.xpose.msra.mxu0 %v977_v26  ;;  %1439 = vmatprep.mubr.msk.bf16.mxu1 %vm1795_vm0, %v1793_v3  ;;  %v1606_v26 = vld [vmem:[#allocation8 + $0x20] sm:$0xff]  }
 0x49a   : > { %1463 = vmatprep.mubr.msk.bf16.mxu0 %vm1795_vm0, %v1793_v3  ;;  %1443 = vmatprep.subr.bf16.mxu1 %v1793_v3 }
 0x49b   : > { %1473 = vmatprep.subr.bf16.mxu0 %v1793_v3 }
 0x49f   : > { %1440 = vmatmul.mubr.msk.bf16.vlgmr.msra.gmra.mrb[12].mxu1 %vm615_vm1, %v728_v16 }
 0x4a0   : > { %1464 = vmatmul.mubr.msk.bf16.vlgmr.msra.gmra.mrb[8].mxu0 %vm615_vm1, %v970_v27  ;;  %1445 = vmatprep.mubr.msk.bf16.mxu1 %vm1795_vm0, %v1793_v3 }
 0x4a1   : > { %1489 = vmatprep.mubr.msk.bf16.mxu0 %vm1795_vm0, %v1793_v3  ;;  %1474 = vmatpush3.bf16.msra.mxu0 %v1602_v22 }
 0x4a2   : > { %1475 = vmatprep.subr.bf16.mxu0 %v1793_v3 }
 0x4a5   : > { %1476 = vmatpush3.bf16.msra.mxu0 %v1603_v23 }
 0x4a6   : > { %1477 = vmatprep.subr.bf16.mxu0 %v1793_v3 }
 0x4a9   : > { %1478 = vmatpush3.bf16.msra.mxu0 %v1604_v24 }
 0x4aa   : > { %1479 = vmatprep.subr.bf16.mxu0 %v1793_v3 }
 0x4ad   : > { %1480 = vmatpush3.bf16.msra.mxu0 %v1605_v25 }
 0x4ae   : > { %1481 = vmatprep.subr.bf16.mxu0 %v1793_v3 }
 0x4b1   : > { %1482 = vmatpush3.bf16.msra.mxu0 %v1606_v26 }
 0x4b2   : > { %1483 = vmatprep.subr.bf16.mxu0 %v1793_v3 }
 0x56a   : > { %v717_v28 = vpop.f32.mrb[8].mxu1 }
 0x56b   : > { %v723_v29 = vpack.c.bf16 %v717_v28, %v717_v28  ;;  %v1435_v30 = vpop.f32.mrb[9].mxu1  ;;  %v893_v31 = vpop.f32.mrb[4].mxu0  ;;  %v1607_v28 = vld [vmem:[#allocation8 + $0x28] sm:$0xff]  }
 0x56c   : > { %v899_v32 = vmul.f32 0.17677669, %v893_v31  ;;  %v720_v33 = vpop.f32.mrb[10].mxu1  ;;  %v1453_v34 = vpop.f32.mrb[5].mxu0  ;;  %1484 = vmatpush3.bf16.msra.mxu0 %v1607_v28 }
 0x56d   : > { %725 = vst.msk [vmem:[#allocation2] sm:$0xf] %vm724_vm4, %v723_v29  ;;  %v1436_v35 = vpop.f32.mrb[11].mxu1  ;;  %v896_v36 = vpop.f32.mrb[6].mxu0  ;;  %1485 = vmatprep.subr.bf16.mxu0 %v1793_v3  ;;  %v1608_v33 = vld [vmem:[#allocation8 + $0x30] sm:$0xff]  }
 0x56e   : > { %v1454_v37 = vpop.f32.mrb[7].mxu0  ;;  %v900_v38 = vsel %vm663_vm3, %v899_v32, -inf  ;;  %v1609_v35 = vld [vmem:[#allocation8 + $0x38] sm:$0xff]  }
 0x56f   : > { %901 = vmax.xlane.f32.xlu1 %v900_v38 }
 0x570   : > { %1486 = vmatpush3.bf16.msra.mxu0 %v1608_v33 }
 0x571   : > { %1487 = vmatprep.subr.bf16.mxu0 %v1793_v3 }
 0x572   : > { %v772_v39 = vpop.f32.mrb[12].mxu1 }
 0x573   : > { %v778_v40 = vmul.f32 0.17677669, %v772_v39  ;;  %v1441_v41 = vpop.f32.mrb[13].mxu1  ;;  %v1013_v42 = vpop.f32.mrb[8].mxu0 }
 0x574   : > { %v775_v43 = vpop.f32.mrb[14].mxu1  ;;  %v1465_v44 = vpop.f32.mrb[9].mxu0  ;;  %v1019_v45 = vmul.f32 0.17677669, %v1013_v42  ;;  %1488 = vmatpush3.bf16.msra.mxu0 %v1609_v35 }
 0x575   : > { %v1442_v46 = vpop.f32.mrb[15].mxu1  ;;  %v1016_v47 = vpop.f32.mrb[10].mxu0  ;;  %v779_v48 = vsel %vm663_vm3, %v778_v40, -inf }
 0x576   : > { %v1466_v49 = vpop.f32.mrb[11].mxu0  ;;  %780 = vmax.xlane.f32.xlu0 %v779_v48  ;;  %v1020_v50 = vsel %vm663_vm3, %v1019_v45, -inf  ;;  %v1355_v48 = vld [vmem:[%s2182_s6] ss:$0 sm:$0xff] }
 0x57a   : > { %1021 = vmax.xlane.f32.xlu0 %v1020_v50 }
 0x5fc   : > { %v902_v51 = vpop.xlane.xlu1 %901 }
 0x5fd   : > { %v903_v52 = vsub.f32 %v899_v32, %v902_v51 }
 0x5ff   : > { %v904_v53 = vmul.f32 1.442695, %v903_v52 }
 0x601   : > { %1616 = vpow2.f32 %v904_v53 }
 0x603   : > { %v781_v54 = vpop.xlane.xlu0 %780 }
 0x604   : > { %v782_v55 = vsub.f32 %v778_v40, %v781_v54 }
 0x606   : > { %v783_v56 = vmul.f32 1.442695, %v782_v55 }
 0x607   : > { %v1022_v57 = vpop.xlane.xlu0 %1021 }
 0x608   : > { %1618 = vpow2.f32 %v783_v56  ;;  %v1023_v58 = vsub.f32 %v1019_v45, %v1022_v57 }
 0x60a   : > { %v1024_v59 = vmul.f32 1.442695, %v1023_v58 }
 0x60b   : > { %v1617_v60 = vpop.eup %1616 }
 0x60c   : > { %1620 = vpow2.f32 %v1024_v59  ;;  %v906_v61 = vsel %vm663_vm3, %v1617_v60, 0.0 }
 0x60d   : > { %907 = vadd.xlane.f32.xlu0 %v906_v61 }
 0x612   : > { %v1619_v62 = vpop.eup %1618 }
 0x613   : > { %v785_v1 = vsel %vm663_vm3, %v1619_v62, 0.0 }
 0x614   : > { %786 = vadd.xlane.f32.xlu0 %v785_v1 }
 0x616   : > { %v1621_v2 = vpop.eup %1620 }
 0x617   : > { %v1026_v4 = vsel %vm663_vm3, %v1621_v2, 0.0 }
 0x618   : > { %1027 = vadd.xlane.f32.xlu1 %v1026_v4 }
 0x629   : > { %912 = vrot.lane.b32.xlu1 %v2055_v63, %s1798_s16 }
 0x62a   : > { %792 = vrot.lane.b32.xlu0 %v2055_v63, %s1796_s12 }
 0x62d   : > { %1032 = vrot.lane.b32.xlu1 %v2055_v63, %s1797_s22 }
 0x69a   : > { %v908_v5 = vpop.xlane.xlu0 %907 }
 0x6a1   : > { %v787_v6 = vpop.xlane.xlu0 %786 }
 0x6a2   : > { %1622 = vrcp.f32 %v787_v6 }
 0x6a3   : > { %1624 = vrcp.f32 %v908_v5 }
 0x6a5   : > { %v793_v7 = vpop.permute.xlu0 %792  ;;  %v1028_v9 = vpop.xlane.xlu1 %1027 }
 0x6a6   : > { %v798_v8 = vsel %vm679_vm2, %v793_v7, 0  ;;  %1626 = vrcp.f32 %v1028_v9 }
 0x6a7   : > { %1444 = vmatpush3.bf16.msra.mxu1 %v798_v8 }
 0x6a8   : > { %1455 = vmatprep.subr.bf16.mxu1 %v1793_v3 }
 0x6a9   : > { %v913_v12 = vpop.permute.xlu1 %912 }
 0x6aa   : > { %v918_v15 = vsel %vm679_vm2, %v913_v12, 0 }
 0x6ac   : > { %v1623_v10 = vpop.eup %1622 }
 0x6ad   : > { %v789_v11 = vmul.f32 %v1623_v10, %v1619_v62  ;;  %v1625_v14 = vpop.eup %1624  ;;  %v1033_v16 = vpop.permute.xlu1 %1032 }
 0x6ae   : > { %v910_v63 = vmul.f32 %v1625_v14, %v1617_v60  ;;  %v1038_v19 = vsel %vm679_vm2, %v1033_v16, 0 }
 0x6af   : > { %v790_v13 = vpack.c.bf16 %v789_v11, %v789_v11 }
 0x6b0   : > { %v911_v17 = vpack.c.bf16 %v910_v63, %v910_v63  ;;  %v1627_v18 = vpop.eup %1626 }
 0x6b1   : > { %1446 = vmatmul.mubr.msk.bf16.vlgmr.msra.gmra.mrb[16].mxu1 %vm663_vm3, %v790_v13  ;;  %v1030_v20 = vmul.f32 %v1627_v18, %v1621_v2 }
 0x6b2   : > { %1456 = vmatpush3.bf16.msra.mxu1 %v918_v15  ;;  %1457 = vmatprep.mubr.msk.bf16.mxu1 %vm1795_vm0, %v1793_v3 }
 0x6b3   : > { %1467 = vmatprep.subr.bf16.mxu1 %v1793_v3  ;;  %v1031_v21 = vpack.c.bf16 %v1030_v20, %v1030_v20 }
 0x6b9   : > { %1458 = vmatmul.mubr.msk.bf16.vlgmr.msra.gmra.mrb[20].mxu1 %vm663_vm3, %v911_v17 }
 0x6ba   : > { %1468 = vmatpush3.bf16.msra.mxu1 %v1038_v19  ;;  %1469 = vmatprep.mubr.msk.bf16.mxu1 %vm1795_vm0, %v1793_v3 }
 0x6c1   : > { %1470 = vmatmul.mubr.msk.bf16.vlgmr.msra.gmra.mrb[24].mxu1 %vm663_vm3, %v1031_v21 }
 0x784   : > { %v834_v27 = vpop.f32.mrb[16].mxu1 }
 0x785   : > { %v1368_v29 = vpack.c.bf16 %v834_v27, %v834_v27  ;;  %v1447_v30 = vpop.f32.mrb[17].mxu1 }
 0x786   : > { %v837_v31 = vpop.f32.mrb[18].mxu1 }
 0x787   : > { %844 = vrot.lane.b32.xlu1 %v1368_v29, %s1797_s22  ;;  %v1448_v32 = vpop.f32.mrb[19].mxu1 }
 0x78c   : > { %v954_v34 = vpop.f32.mrb[20].mxu1 }
 0x78d   : > { %v1369_v36 = vpack.c.bf16 %v954_v34, %v954_v34  ;;  %v1459_v37 = vpop.f32.mrb[21].mxu1 }
 0x78e   : > { %v957_v38 = vpop.f32.mrb[22].mxu1 }
 0x78f   : > { %964 = vrot.lane.b32.xlu0 %v1369_v36, %s1798_s16  ;;  %v1460_v39 = vpop.f32.mrb[23].mxu1 }
 0x794   : > { %v1074_v40 = vpop.f32.mrb[24].mxu1 }
 0x795   : > { %v1370_v41 = vpack.c.bf16 %v1074_v40, %v1074_v40  ;;  %v1471_v42 = vpop.f32.mrb[25].mxu1 }
 0x796   : > { %v1077_v43 = vpop.f32.mrb[26].mxu1 }
 0x797   : > { %1084 = vrot.lane.b32.xlu1 %v1370_v41, %s1796_s12  ;;  %v1472_v44 = vpop.f32.mrb[27].mxu1  ;;  %s1718_s12 = sshll.u32 %s1799_s10, 4  ;;  %s1719_s12 = int_to_ptr.vmem [resolvable:$false] %s1718_s12 }
 0x798   : > { %s1720_s22 = scalar_lea.vmem %s1719_s12, 256  ;;  %p1721_p5 = scmp.lt.s32.totalorder %s2134_s9, %s1719_s12 }
 0x799   : > { %p1722_p9 = scmp.lt.s32.totalorder %s1720_s22, %s1714_s14 }
 0x79b   : > { %p1723_p12 = por %p1722_p9, %p1721_p5 }
 0x79d   : > { %p1724_p2 = pnand %p1723_p12, %p1717_p3 }
 0x7f9   : > { %v845_v45 = vpop.permute.xlu1 %844 }
 0x7fa   : > { %848 = vst.msk [vmem:[#allocation2] sm:$0xf] %vm847_vm5, %v845_v45 }
 0x801   : > { %v965_v46 = vpop.permute.xlu0 %964 }
 0x802   : > { %968 = vst.msk [vmem:[#allocation2] sm:$0xf] %vm967_vm6, %v965_v46 }
 0x809   : > { %v1085_v3 = vpop.permute.xlu1 %1084 }
 0x80a   : > { %1088 = vst.msk [vmem:[#allocation2] sm:$0xf] %vm1087_vm7, %v1085_v3 }
 0x811   : > { %v1089_v47 = vld [vmem:[#allocation2] sm:$0xf] }
 0x812   : > { %1490 = vmatmul.mubr.bf16.vlgmr.msra.gmra.mrb[12].mxu0 %v1089_v47 }
 0x8e5   : > { %v1195_v49 = vpop.f32.mrb[12].mxu0 }
 0x8e6   : > { %v1196_v50 = vadd.f32 %v1355_v48, %v1195_v49  ;;  %v1491_v51 = vpop.f32.mrb[13].mxu0 }
 0x8e7   : > { %v1198_v52 = vpop.f32.mrb[14].mxu0 }
 0x8e8   : > { %v1201_v53 = vadd.f32 %v1196_v50, %v2023_v0  ;;  %v1492_v54 = vpop.f32.mrb[15].mxu0 }
 0x8ea   : > { %1202 = vst [vmem:[%s322_s30] sm:$0xff] %v1201_v53 }
 0x8eb   : > { %1727 = shalt.err (!%p1724_p2)
}
 0x8ec   : > { %s1728_s15 = scalar_lea.hbm %s2132_s29, 128  ;;  %s1732_s20 = scalar_lea.hbm %s2183_s7, 256 }
 0x8ed   : > { %p1729_p13 = scmp.ne.s32.totalorder %s2132_s29, %s1728_s15  ;;  %p1733_p4 = scmp.lt.u32.totalorder %s2132_s29, %s2183_s7 }
 0x8ee   : > { %p1734_p7 = scmp.lt.u32.totalorder %s1732_s20, %s1728_s15  ;;  %p1736_p11 = scmp.lt.u32.totalorder %s1728_s15, %s2132_s29 }
 0x8ef   : > { %p1730_p6 = pnand %p1729_p13, %p2197_p0 }
 0x8f0   : > { %p1735_p8 = por %p1734_p7, %p1733_p4 }
 0x8f1   : > { %p1731_p10 = pneg %p1730_p6 }
 0x8f2   : > { %p1737_p1 = por %p1736_p11, %p1735_p8 }
 0x8f4   : > { %p1738_p3 = pnand %p1737_p1, %p1731_p10 }
 0x8f6   : > { %1741 = shalt.err (!%p1738_p3)
}
 0x8f7   : > { %1503 = dma.vmem_to_hbm [thread:$0]  (%p2197_p0), %s2134_s9, 128, %s2132_s29, %s1204_s28  }
 0x8f8 PF: > { %s1229_s11 = sand.u32 1, %s1772_s24   ;;  %p2198_p5 = scmp.ne.s32.totalorder %s2188_s8, 0 }
 0x8f9   : > { %p2199_p9 = scmp.ge.s32.totalorder %s1784_s27, 2  ;;  %s1230_s23 = scalar_lea.sflag [#allocation5], %s1229_s11 }
 0x8fb   : > { %p1517_p12 = pnand %p2199_p9, %p2198_p5 }
 0x8fd   : > { %1767 = dma.done.wait (!%p1517_p12), %s1230_s23, 128  }
 0x8fe   : > { %1769 = vsyncadd (!%p1517_p12), %s1230_s23, 4294967168  ;;  %p21_p2 = scmp.ge.s32.totalorder %s1950_s13, 4   ;;  %s2200_s24 = smov %s1776_s25 }
 0x8ff   : > { %s2201_s25 = smov %s1780_s26  ;;  %s2202_s26 = smov %s1959_s17 }
 0x900   : > { %s2203_s27 = smov %s1950_s13  ;;  %23 = sbr.rel (!%p21_p2) target bundleno = 6 (0x6), region = 101 }
 0x907   :  { %1235 = vsyncpa [#allocation4], 1 }
 0x908   :  { %1237 = vsyncpa [#allocation4 + $0x1], 1 }
 0x909   :  { %1238 = vsyncpa [#allocation7], 1 }
 0x90a   :  { %1239 = vsyncpa [#allocation5], 1 }
 0x90b   :  { %1241 = vsyncpa [#allocation5 + $0x1], 1 }

</bundles_post_ra>
